<compile_context>
chip_gen: v6e
topology: v6e:2x2x1
jax: 0.10.0
libtpu: 0.0.40
codegen_flags: <defaults>
</compile_context>

<pallas_src>
import functools
import numpy as np
import jax
import jax.numpy as jnp
from jax.experimental import pallas as pl
from jax.experimental.pallas import tpu as pltpu


# ----------------------------------------------------------------------------- helpers

def _vmem_limit_bytes():
    """Per-generation scoped-VMEM budget: ~100 MiB on 128 MiB parts (v5e/v6e),
    ~3/4 of capacity (<= 48 MiB) on 64 MiB-per-core parts (v7x)."""
    mib = 1 << 20
    try:
        cap = int(pltpu.get_tpu_info().vmem_capacity_bytes)
    except Exception:
        cap = 64 * mib                      # conservative default (safe everywhere)
    if cap >= 100 * mib:                    # 128 MiB parts: use most of it
        return int(min(cap - 16 * mib, 100 * mib))
    return int(min(3 * cap // 4, 48 * mib))  # v7x / unknown: keep headroom


def _round8(n):
    return -(-n // 8) * 8


def _choose_bt(B, SD, SE, S, SE3, in_bytes, budget):
    """Batch-tile rows: as large as the budget allows (up to 256), multiple of 8,
    and leaving >= 2 grid steps when B is big enough (dual-TC split on v7x)."""
    if B <= 8:
        return B
    Bp8 = _round8(B)
    bt = min(256, Bp8)
    if Bp8 >= 16:                            # keep at least 2 grid steps
        bt = min(bt, _round8(Bp8 // 2))
    w_resident = SD * SE3 * in_bytes + SE3 * 4
    while bt > 8:
        per_tile = (2 * bt * SD * in_bytes   # x tile, double buffered
                    + 2 * bt * SE * 4        # out tile, double buffered
                    + bt * SE3 * 4           # qkv intermediate
                    + 2 * bt * S * S * 4)    # scores / attn intermediates
        if w_resident + per_tile <= budget:
            break
        bt = max(8, (bt // 2 // 8) * 8)
        if bt == 8:
            break
    return bt


def _choose_tk(SD, SE3, in_bytes, budget):
    """Largest K-tile (multiple of 128 dividing SD) whose double-buffered weight slab
    fits in roughly a third of the VMEM budget."""
    tk = 128
    for t in range(128, SD + 1, 128):
        if SD % t == 0 and 2 * t * SE3 * in_bytes <= budget // 3:
            tk = t
    return tk


# ----------------------------------------------------------------------------- kernels

def _attention_math(qkv, *, seq_length, qkv_size, masked, out_dtype):
    """Shared attention epilogue on a full (bt, 3*S*E) qkv slab (f32)."""
    S, E = seq_length, qkv_size
    SE = S * E
    bt = qkv.shape[0]

    # In-register re-layout flat -> (bt, S, E).
    # TODO(synk): with E < 128 these reshapes split lanes into sublanes (XLU copies);
    # padding E up to a lane multiple in the fused weight layout would remove them.
    q = qkv[:, 0 * SE:1 * SE].reshape(bt, S, E)
    k = qkv[:, 1 * SE:2 * SE].reshape(bt, S, E)
    v = qkv[:, 2 * SE:3 * SE].reshape(bt, S, E)   # 1/sqrt(E) already folded into WV/bV

    # scores[b, t, s] = Q[b, t, :] . K[b, s, :]
    scores = jnp.einsum('bte,bse->bts', q, k, preferred_element_type=jnp.float32)
    if masked:
        rows = jax.lax.broadcasted_iota(jnp.int32, (S, S), 0)   # t
        cols = jax.lax.broadcasted_iota(jnp.int32, (S, S), 1)   # s
        mask = jnp.where(cols > rows, jnp.float32(-1e20), jnp.float32(0.0))
        scores = scores + mask[None, :, :]

    # nn.Softmax(dim=1): normalize over the query/target axis (axis=1), as in the module.
    m = jnp.max(scores, axis=1, keepdims=True)
    p = jnp.exp(scores - m)
    inv = pl.reciprocal(jnp.sum(p, axis=1, keepdims=True), approx=True)
    attn = p * inv

    z = jnp.einsum('bts,bse->bte', attn, v, preferred_element_type=jnp.float32)
    return z.reshape(bt, SE).astype(out_dtype)


def _attn_kernel_resident(x_ref, w_ref, b_ref, out_ref, *, seq_length, qkv_size, masked):
    """Resident-weight path: one fused MXU matmul + attention per batch tile.
    x_ref: (bt, S*D)  w_ref: (S*D, 3*S*E)  b_ref: (1, 3*S*E)  out_ref: (bt, S*E)."""
    qkv = jnp.dot(x_ref[...], w_ref[...], preferred_element_type=jnp.float32)
    qkv = qkv + b_ref[...]
    out_ref[...] = _attention_math(qkv, seq_length=seq_length, qkv_size=qkv_size,
                                   masked=masked, out_dtype=out_ref.dtype)


def _attn_kernel_stream(x_ref, w_ref, b_ref, out_ref, qkv_acc,
                        *, seq_length, qkv_size, masked):
    """Weight-streaming path: grid = (batch tiles, K tiles over S*D).
    x_ref: (bt, tk)  w_ref: (tk, 3*S*E)  b_ref: (1, 3*S*E)  qkv_acc: (bt, 3*S*E) f32."""
    kk = pl.program_id(1)

    @pl.when(kk == 0)
    def _():
        qkv_acc[...] = jnp.zeros_like(qkv_acc)

    qkv_acc[...] += jnp.dot(x_ref[...], w_ref[...], preferred_element_type=jnp.float32)

    @pl.when(kk == pl.num_programs(1) - 1)
    def _():
        qkv = qkv_acc[...] + b_ref[...]
        out_ref[...] = _attention_math(qkv, seq_length=seq_length, qkv_size=qkv_size,
                                       masked=masked, out_dtype=out_ref.dtype)


# ----------------------------------------------------------------------------- wrapper

def prepare_params(params, *, qkv_size, compute_dtype=jnp.bfloat16):
    """One-time parameter prep (outside the kernel): fold 1/sqrt(qkv_size) into WV/bV,
    pre-transpose, fuse [WQ | WK | WV] along the output-feature dim, and pre-cast the
    fused weight to the compute dtype (default bf16 streaming). Bias stays f32."""
    WQ, bQ, WK, bK, WV, bV = params
    coeff = jnp.float32(1.0 / np.sqrt(float(qkv_size)))
    w_fused = jnp.concatenate([WQ.T, WK.T, (coeff * WV).T], axis=1)      # (S*D, 3*S*E)
    b_fused = jnp.concatenate([bQ, bK, coeff * bV], axis=0)[None, :]     # (1, 3*S*E)
    return w_fused.astype(compute_dtype), b_fused.astype(jnp.float32)


def attention_head_pallas(x, w_fused, b_fused, *, seq_length, qkv_size,
                          masked=False, force_k_tile=None):
    """x: (B, seq_length, emb_size) -> (B, seq_length, qkv_size). Compute dtype is
    taken from the pre-cast fused weight; accumulation and softmax are f32."""
    B, S_in, D = x.shape
    assert S_in == seq_length
    S, E = seq_length, qkv_size
    SD, SE = S * D, S * E
    SE3 = 3 * SE
    assert w_fused.shape == (SD, SE3) and b_fused.shape == (1, SE3)

    compute_dtype = w_fused.dtype
    in_bytes = jnp.dtype(compute_dtype).itemsize
    budget = _vmem_limit_bytes()

    x_flat = x.reshape(B, SD).astype(compute_dtype)       # module does .float(); bf16 optional

    bt = _choose_bt(B, SD, SE, S, SE3, in_bytes, budget)
    Bp = -(-B // bt) * bt
    if Bp != B:
        x_flat = jnp.pad(x_flat, ((0, Bp - B), (0, 0)))

    w_bytes = SD * SE3 * in_bytes
    use_stream = (force_k_tile is not None) or (w_bytes > budget // 2
                                                and SD % 128 == 0 and SD > 128)

    cost = pl.CostEstimate(
        flops=2 * Bp * SD * SE3 + 4 * Bp * S * S * E,
        transcendentals=Bp * S * S,
        bytes_accessed=Bp * SD * in_bytes + w_bytes + SE3 * 4 + Bp * SE * 4)

    def build(single_buffer_constants):
        pm = (dict(pipeline_mode=pl.Buffered(1)) if single_buffer_constants else {})
        if not use_stream:
            grid = (Bp // bt,)
            kernel = functools.partial(_attn_kernel_resident,
                                       seq_length=S, qkv_size=E, masked=masked)
            in_specs = [
                pl.BlockSpec((bt, SD), lambda i: (i, 0)),            # input tile
                pl.BlockSpec((SD, SE3), lambda i: (0, 0), **pm),     # fused weight (resident)
                pl.BlockSpec((1, SE3), lambda i: (0, 0), **pm),      # fused bias   (resident)
            ]
            out_specs = pl.BlockSpec((bt, SE), lambda i: (i, 0))
            scratch = []
            sem = ("parallel",)
        else:
            tk = force_k_tile if force_k_tile is not None else _choose_tk(SD, SE3, in_bytes, budget)
            assert SD % tk == 0
            grid = (Bp // bt, SD // tk)
            kernel = functools.partial(_attn_kernel_stream,
                                       seq_length=S, qkv_size=E, masked=masked)
            in_specs = [
                pl.BlockSpec((bt, tk), lambda i, k: (i, k)),         # input K-slab
                pl.BlockSpec((tk, SE3), lambda i, k: (k, 0)),        # streamed weight slab
                pl.BlockSpec((1, SE3), lambda i, k: (0, 0), **pm),   # fused bias (resident)
            ]
            out_specs = pl.BlockSpec((bt, SE), lambda i, k: (i, 0))
            scratch = [pltpu.VMEM((bt, SE3), jnp.float32)]           # qkv accumulator
            sem = ("parallel", "arbitrary")
        return pl.pallas_call(
            kernel,
            out_shape=jax.ShapeDtypeStruct((Bp, SE), jnp.float32),
            grid=grid,
            in_specs=in_specs,
            out_specs=out_specs,
            scratch_shapes=scratch,
            compiler_params=pltpu.CompilerParams(
                dimension_semantics=sem, vmem_limit_bytes=budget),
            cost_estimate=cost,
        )

    try:
        out_flat = jax.block_until_ready(build(True)(x_flat, w_fused, b_fused))
    except Exception:
        # Fallback if this jax build rejects pipeline_mode=pl.Buffered(1) on constants.
        out_flat = build(False)(x_flat, w_fused, b_fused)

    return out_flat[:B].reshape(B, S, E)


# ----------------------------------------------------------------------------- reference

def attention_head_reference(x, params, *, seq_length, qkv_size, masked=False):
    """Pure-JAX mirror of the PyTorch AttentionHead.forward (for verification)."""
    WQ, bQ, WK, bK, WV, bV = params
    B = x.shape[0]
    S, E = seq_length, qkv_size
    xf = x.reshape(B, -1).astype(jnp.float32)
    Q = (xf @ WQ.T + bQ).reshape(B, S, E)
    K = (xf @ WK.T + bK).reshape(B, S, E)
    V = (xf @ WV.T + bV).reshape(B, S, E)
    scores = jnp.einsum('bte,bse->bts', Q, K)
    if masked:
        scores = scores + jnp.triu(jnp.full((S, S), -1e20, jnp.float32), k=1)[None]
    attn = jax.nn.softmax(scores, axis=1)                   # nn.Softmax(dim=1)
    Z = jnp.einsum('bts,bse->bte', attn, V)
    return Z / jnp.sqrt(jnp.float32(E))


def init_params(key, *, seq_length, emb_size, qkv_size):
    """Synthetic parameters with PyTorch nn.Linear shapes/initialization."""
    in_f = seq_length * emb_size
    out_f = seq_length * qkv_size
    ks = jax.random.split(key, 6)
    bound = 1.0 / np.sqrt(in_f)
    u = lambda k, shape: jax.random.uniform(k, shape, jnp.float32, -bound, bound)
    WQ, bQ = u(ks[0], (out_f, in_f)), u(ks[1], (out_f,))
    WK, bK = u(ks[2], (out_f, in_f)), u(ks[3], (out_f,))
    WV, bV = u(ks[4], (out_f, in_f)), u(ks[5], (out_f,))
    return WQ, bQ, WK, bK, WV, bV


if __name__ == "__main__":
    root = jax.random.PRNGKey(0)
    kx1, kp1, kx2, kp2 = jax.random.split(root, 4)

    # --- Case 1: resident-weight path, f32 (faithful to the module's .float()) ---
    B, S, D, E = 2, 8, 16, 16
    x = jax.random.normal(kx1, (B, S, D), jnp.float32)
    params = init_params(kp1, seq_length=S, emb_size=D, qkv_size=E)
    w32, b32 = prepare_params(params, qkv_size=E, compute_dtype=jnp.float32)
    for masked in (False, True):
        out = attention_head_pallas(x, w32, b32, seq_length=S, qkv_size=E, masked=masked)
        out = jax.block_until_ready(out)
        ref = attention_head_reference(x, params, seq_length=S, qkv_size=E, masked=masked)
        assert out.shape == (B, S, E)
        np.testing.assert_allclose(np.asarray(out), np.asarray(ref), rtol=1e-2, atol=1e-2)

    # --- Case 2: default bf16 streaming (f32 accumulation + f32 softmax) ---
    wbf, bbf = prepare_params(params, qkv_size=E)          # default compute_dtype=bf16
    out = jax.block_until_ready(
        attention_head_pallas(x, wbf, bbf, seq_length=S, qkv_size=E, masked=False))
    ref = attention_head_reference(x, params, seq_length=S, qkv_size=E, masked=False)
    np.testing.assert_allclose(np.asarray(out), np.asarray(ref), rtol=1e-1, atol=1e-1)

    # --- Case 3: K-tiled weight-streaming path + batch tiling/padding (B=24, S*D=256) ---
    B2, S2, D2, E2 = 24, 8, 32, 16
    x2 = jax.random.normal(kx2, (B2, S2, D2), jnp.float32)
    params2 = init_params(kp2, seq_length=S2, emb_size=D2, qkv_size=E2)
    w2, b2 = prepare_params(params2, qkv_size=E2, compute_dtype=jnp.float32)
    out2 = jax.block_until_ready(
        attention_head_pallas(x2, w2, b2, seq_length=S2, qkv_size=E2, masked=True,
                              force_k_tile=128))
    ref2 = attention_head_reference(x2, params2, seq_length=S2, qkv_size=E2, masked=True)
    assert out2.shape == (B2, S2, E2)
    np.testing.assert_allclose(np.asarray(out2), np.asarray(ref2), rtol=1e-2, atol=1e-2)

    print("KERNEL_OK")
</pallas_src>

<mosaic_0001>
module attributes {stable_mosaic.version = 11 : i64} {
  func.func @_attn_kernel_resident(%arg0: i32, %arg1: memref<2x128xf32, #tpu.memory_space<vmem>>, %arg2: memref<128x384xf32, #tpu.memory_space<vmem>>, %arg3: memref<1x384xf32, #tpu.memory_space<vmem>>, %arg4: memref<2x128xf32, #tpu.memory_space<vmem>>) attributes {dimension_semantics = [#tpu.dimension_semantics<parallel>], iteration_bounds = array<i64: 1>, scalar_prefetch = 0 : i64, scratch_operands = 0 : i64, tpu.core_type = #tpu.core_type<tc>, window_params = [{transform_indices = @transform_0, window_bounds = array<i64: 2, 128>}, {pipeline_mode = #tpu.pipeline_mode<synchronous>, transform_indices = @transform_1, window_bounds = array<i64: 128, 384>}, {pipeline_mode = #tpu.pipeline_mode<synchronous>, transform_indices = @transform_2, window_bounds = array<i64: 1, 384>}, {transform_indices = @transform_3, window_bounds = array<i64: 2, 128>}]} {
    %c0 = arith.constant 0 : index
    %c0_0 = arith.constant 0 : index
    %0 = vector.load %arg1[%c0, %c0_0] : memref<2x128xf32, #tpu.memory_space<vmem>>, vector<2x128xf32>
    %c0_1 = arith.constant 0 : index
    %c0_2 = arith.constant 0 : index
    %1 = vector.load %arg2[%c0_1, %c0_2] : memref<128x384xf32, #tpu.memory_space<vmem>>, vector<128x384xf32>
    %cst = arith.constant dense<0.000000e+00> : vector<2x384xf32>
    %2 = tpu.matmul %0, %1, %cst {dimension_numbers = #tpu.dot_dimension_numbers<[1], [0], [0], [1], [0, 0, 1, 1], [], []>} : vector<2x128xf32>, vector<128x384xf32>, vector<2x384xf32> -> vector<2x384xf32>
    %c0_3 = arith.constant 0 : index
    %c0_4 = arith.constant 0 : index
    %3 = vector.load %arg3[%c0_3, %c0_4] : memref<1x384xf32, #tpu.memory_space<vmem>>, vector<1x384xf32>
    %4 = vector.broadcast %3 : vector<1x384xf32> to vector<2x384xf32>
    %5 = arith.addf %2, %4 : vector<2x384xf32>
    %6 = vector.extract_strided_slice %5 {offsets = [0, 0], sizes = [2, 128], strides = [1, 1]} : vector<2x384xf32> to vector<2x128xf32>
    %7 = vector.shape_cast %6 : vector<2x128xf32> to vector<2x8x16xf32>
    %8 = vector.extract_strided_slice %5 {offsets = [0, 128], sizes = [2, 128], strides = [1, 1]} : vector<2x384xf32> to vector<2x128xf32>
    %9 = vector.shape_cast %8 : vector<2x128xf32> to vector<2x8x16xf32>
    %10 = vector.extract_strided_slice %5 {offsets = [0, 256], sizes = [2, 128], strides = [1, 1]} : vector<2x384xf32> to vector<2x128xf32>
    %11 = vector.shape_cast %10 : vector<2x128xf32> to vector<2x8x16xf32>
    "tpu.trace_start"() <{level = 10 : i32, message = "bte,bse->bts"}> : () -> ()
    %cst_5 = arith.constant dense<0.000000e+00> : vector<2x8x8xf32>
    %12 = tpu.matmul %7, %9, %cst_5 {dimension_numbers = #tpu.dot_dimension_numbers<[2], [2], [1], [1], [0, 0, 0, 1, 1, 1], [0], [0]>} : vector<2x8x16xf32>, vector<2x8x16xf32>, vector<2x8x8xf32> -> vector<2x8x8xf32>
    "tpu.trace_stop"() : () -> ()
    %cst_6 = arith.constant dense<0xFF800000> : vector<2x8xf32>
    %13 = vector.multi_reduction <maximumf>, %12, %cst_6 [1] : vector<2x8x8xf32> to vector<2x8xf32>
    %14 = vector.shape_cast %13 : vector<2x8xf32> to vector<2x1x8xf32>
    %15 = vector.broadcast %14 : vector<2x1x8xf32> to vector<2x8x8xf32>
    %16 = arith.subf %12, %15 : vector<2x8x8xf32>
    %17 = math.exp %16 : vector<2x8x8xf32>
    %cst_7 = arith.constant dense<0.000000e+00> : vector<2x8xf32>
    %18 = vector.multi_reduction <add>, %17, %cst_7 [1] : vector<2x8x8xf32> to vector<2x8xf32>
    %19 = vector.shape_cast %18 : vector<2x8xf32> to vector<2x1x8xf32>
    %20 = tpu.reciprocal %19 {approx = true} : vector<2x1x8xf32> -> vector<2x1x8xf32>
    %21 = vector.broadcast %20 : vector<2x1x8xf32> to vector<2x8x8xf32>
    %22 = arith.mulf %17, %21 : vector<2x8x8xf32>
    "tpu.trace_start"() <{level = 10 : i32, message = "bts,bse->bte"}> : () -> ()
    %cst_8 = arith.constant dense<0.000000e+00> : vector<2x8x16xf32>
    %23 = tpu.matmul %22, %11, %cst_8 {dimension_numbers = #tpu.dot_dimension_numbers<[2], [1], [1], [2], [0, 0, 0, 1, 1, 2], [0], [0]>} : vector<2x8x8xf32>, vector<2x8x16xf32>, vector<2x8x16xf32> -> vector<2x8x16xf32>
    "tpu.trace_stop"() : () -> ()
    %24 = vector.shape_cast %23 : vector<2x8x16xf32> to vector<2x128xf32>
    %c0_9 = arith.constant 0 : index
    %c0_10 = arith.constant 0 : index
    %25 = vector.load %arg4[%c0_9, %c0_10] : memref<2x128xf32, #tpu.memory_space<vmem>>, vector<2x128xf32>
    tpu.vector_store %arg4[%c0_9, %c0_10], %24 {strides = array<i32>} : memref<2x128xf32, #tpu.memory_space<vmem>>, vector<2x128xf32>,
    return
  }
  func.func @transform_0(%arg0: i32) -> (i32, i32) {
    %c0_i32 = arith.constant 0 : i32
    %c0_i32_0 = arith.constant 0 : i32
    return %arg0, %c0_i32 : i32, i32
  }
  func.func @transform_1(%arg0: i32) -> (i32, i32) {
    %c0_i32 = arith.constant 0 : i32
    %c0_i32_0 = arith.constant 0 : i32
    %c0_i32_1 = arith.constant 0 : i32
    return %c0_i32, %c0_i32_0 : i32, i32
  }
  func.func @transform_2(%arg0: i32) -> (i32, i32) {
    %c0_i32 = arith.constant 0 : i32
    %c0_i32_0 = arith.constant 0 : i32
    %c0_i32_1 = arith.constant 0 : i32
    return %c0_i32, %c0_i32_0 : i32, i32
  }
  func.func @transform_3(%arg0: i32) -> (i32, i32) {
    %c0_i32 = arith.constant 0 : i32
    %c0_i32_0 = arith.constant 0 : i32
    return %arg0, %c0_i32 : i32, i32
  }
}

module attributes {stable_mosaic.version = 11 : i64} {
  func.func @_attn_kernel_resident(%arg0: i32, %arg1: memref<2x128xf32, #tpu.memory_space<vmem>>, %arg2: memref<128x384xf32, #tpu.memory_space<vmem>>, %arg3: memref<1x384xf32, #tpu.memory_space<vmem>>, %arg4: memref<2x128xf32, #tpu.memory_space<vmem>>) attributes {dimension_semantics = [#tpu.dimension_semantics<parallel>], iteration_bounds = array<i64: 1>, scalar_prefetch = 0 : i64, scratch_operands = 0 : i64, tpu.core_type = #tpu.core_type<tc>, window_params = [{transform_indices = @transform_0, window_bounds = array<i64: 2, 128>}, {pipeline_mode = #tpu.pipeline_mode<synchronous>, transform_indices = @transform_1, window_bounds = array<i64: 128, 384>}, {pipeline_mode = #tpu.pipeline_mode<synchronous>, transform_indices = @transform_2, window_bounds = array<i64: 1, 384>}, {transform_indices = @transform_3, window_bounds = array<i64: 2, 128>}]} {
    %c0 = arith.constant 0 : index
    %c0_0 = arith.constant 0 : index
    %0 = vector.load %arg1[%c0, %c0_0] : memref<2x128xf32, #tpu.memory_space<vmem>>, vector<2x128xf32>
    %c0_1 = arith.constant 0 : index
    %c0_2 = arith.constant 0 : index
    %1 = vector.load %arg2[%c0_1, %c0_2] : memref<128x384xf32, #tpu.memory_space<vmem>>, vector<128x384xf32>
    %cst = arith.constant dense<0.000000e+00> : vector<2x384xf32>
    %2 = tpu.matmul %0, %1, %cst {dimension_numbers = #tpu.dot_dimension_numbers<[1], [0], [0], [1], [0, 0, 1, 1], [], []>} : vector<2x128xf32>, vector<128x384xf32>, vector<2x384xf32> -> vector<2x384xf32>
    %c0_3 = arith.constant 0 : index
    %c0_4 = arith.constant 0 : index
    %3 = vector.load %arg3[%c0_3, %c0_4] : memref<1x384xf32, #tpu.memory_space<vmem>>, vector<1x384xf32>
    %4 = vector.broadcast %3 : vector<1x384xf32> to vector<2x384xf32>
    %5 = arith.addf %2, %4 : vector<2x384xf32>
    %6 = vector.extract_strided_slice %5 {offsets = [0, 0], sizes = [2, 128], strides = [1, 1]} : vector<2x384xf32> to vector<2x128xf32>
    %7 = vector.shape_cast %6 : vector<2x128xf32> to vector<2x8x16xf32>
    %8 = vector.extract_strided_slice %5 {offsets = [0, 128], sizes = [2, 128], strides = [1, 1]} : vector<2x384xf32> to vector<2x128xf32>
    %9 = vector.shape_cast %8 : vector<2x128xf32> to vector<2x8x16xf32>
    %10 = vector.extract_strided_slice %5 {offsets = [0, 256], sizes = [2, 128], strides = [1, 1]} : vector<2x384xf32> to vector<2x128xf32>
    %11 = vector.shape_cast %10 : vector<2x128xf32> to vector<2x8x16xf32>
    "tpu.trace_start"() <{level = 10 : i32, message = "bte,bse->bts"}> : () -> ()
    %cst_5 = arith.constant dense<0.000000e+00> : vector<2x8x8xf32>
    %12 = tpu.matmul %7, %9, %cst_5 {dimension_numbers = #tpu.dot_dimension_numbers<[2], [2], [1], [1], [0, 0, 0, 1, 1, 1], [0], [0]>} : vector<2x8x16xf32>, vector<2x8x16xf32>, vector<2x8x8xf32> -> vector<2x8x8xf32>
    "tpu.trace_stop"() : () -> ()
    %cst_6 = arith.constant dense<0xFF800000> : vector<2x8xf32>
    %13 = vector.multi_reduction <maximumf>, %12, %cst_6 [1] : vector<2x8x8xf32> to vector<2x8xf32>
    %14 = vector.shape_cast %13 : vector<2x8xf32> to vector<2x1x8xf32>
    %15 = vector.broadcast %14 : vector<2x1x8xf32> to vector<2x8x8xf32>
    %16 = arith.subf %12, %15 : vector<2x8x8xf32>
    %17 = math.exp %16 : vector<2x8x8xf32>
    %cst_7 = arith.constant dense<0.000000e+00> : vector<2x8xf32>
    %18 = vector.multi_reduction <add>, %17, %cst_7 [1] : vector<2x8x8xf32> to vector<2x8xf32>
    %19 = vector.shape_cast %18 : vector<2x8xf32> to vector<2x1x8xf32>
    %20 = tpu.reciprocal %19 {approx = true} : vector<2x1x8xf32> -> vector<2x1x8xf32>
    %21 = vector.broadcast %20 : vector<2x1x8xf32> to vector<2x8x8xf32>
    %22 = arith.mulf %17, %21 : vector<2x8x8xf32>
    "tpu.trace_start"() <{level = 10 : i32, message = "bts,bse->bte"}> : () -> ()
    %cst_8 = arith.constant dense<0.000000e+00> : vector<2x8x16xf32>
    %23 = tpu.matmul %22, %11, %cst_8 {dimension_numbers = #tpu.dot_dimension_numbers<[2], [1], [1], [2], [0, 0, 0, 1, 1, 2], [0], [0]>} : vector<2x8x8xf32>, vector<2x8x16xf32>, vector<2x8x16xf32> -> vector<2x8x16xf32>
    "tpu.trace_stop"() : () -> ()
    %24 = vector.shape_cast %23 : vector<2x8x16xf32> to vector<2x128xf32>
    %c0_9 = arith.constant 0 : index
    %c0_10 = arith.constant 0 : index
    %25 = vector.load %arg4[%c0_9, %c0_10] : memref<2x128xf32, #tpu.memory_space<vmem>>, vector<2x128xf32>
    tpu.vector_store %arg4[%c0_9, %c0_10], %24 {strides = array<i32>} : memref<2x128xf32, #tpu.memory_space<vmem>>, vector<2x128xf32>,
    return
  }
  func.func @transform_0(%arg0: i32) -> (i32, i32) {
    %c0_i32 = arith.constant 0 : i32
    %c0_i32_0 = arith.constant 0 : i32
    return %arg0, %c0_i32 : i32, i32
  }
  func.func @transform_1(%arg0: i32) -> (i32, i32) {
    %c0_i32 = arith.constant 0 : i32
    %c0_i32_0 = arith.constant 0 : i32
    %c0_i32_1 = arith.constant 0 : i32
    return %c0_i32, %c0_i32_0 : i32, i32
  }
  func.func @transform_2(%arg0: i32) -> (i32, i32) {
    %c0_i32 = arith.constant 0 : i32
    %c0_i32_0 = arith.constant 0 : i32
    %c0_i32_1 = arith.constant 0 : i32
    return %c0_i32, %c0_i32_0 : i32, i32
  }
  func.func @transform_3(%arg0: i32) -> (i32, i32) {
    %c0_i32 = arith.constant 0 : i32
    %c0_i32_0 = arith.constant 0 : i32
    return %arg0, %c0_i32 : i32, i32
  }
}

</mosaic_0001>

<bundles_post_ra>
// kernel: tpu_custom_call.1
= control target key start
LH: loop header
LB: loop body
LE: loop exit
PB: predicated region body
PF: predicated region fallthrough
CT: control target
= control target key end

     0   :  { %8 = vsyncpa [#allocation3], 0  ;;  %s1283_s0 = inlined_call_operand.hbm [shape: f32[2,128], index: 0, kind: input, shape index: {}]   ;;  %s1284_s1 = inlined_call_operand.hbm [shape: f32[128,384], index: 1, kind: input, shape index: {}]   ;;  %s1285_s2 = inlined_call_operand.vmem [shape: f32[1,384], index: 2, kind: input, shape index: {}]   ;;  %s1286_s3 = inlined_call_operand.hbm [shape: f32[2,128], index: 3, kind: output, shape index: {}]  }
   0x1   :  { %9 = vsyncpa [#allocation6], 0 }
   0x2   :  { %10 = vsyncpa [#allocation4], 0  ;;  %s1102_s12 = smov [#allocation2]   ;;  %s1103_s14 = smov [#allocation5]  }
   0x3   :  { %s17_s13 = sshll.u32 %s1102_s12, 4  ;;  %s26_s15 = sshll.u32 %s1103_s14, 4  ;;  %s18_s13 = int_to_ptr.vmem [resolvable:$true] %s17_s13  ;;  %s27_s15 = int_to_ptr.vmem [resolvable:$true] %s26_s15 }
   0x4   :  { %s1044_s16 = scalar_lea.vmem %s18_s13, 32  ;;  %p1049_p1 = scmp.lt.s32.totalorder %s18_s13, %s18_s13 }
   0x5   :  { %p1045_p0 = scmp.ne.s32.totalorder %s18_s13, %s1044_s16  ;;  %p1050_p2 = scmp.lt.s32.totalorder %s1044_s16, %s1044_s16 }
   0x7   :  { %p1051_p3 = por %p1050_p2, %p1049_p1 }
   0x9   :  { %p1052_p4 = pnand %p1051_p3, %p1045_p0 }
   0xb   :  { %1055 = shalt.err (!%p1052_p4)
}
   0xc   :  { %20 = dma.hbm_to_vmem [thread:$0]  %s1283_s0, 32, %s18_s13, [#allocation3]  }
   0xd   :  { %s1064_s19 = scalar_lea.vmem %s27_s15, 6144  ;;  %p1069_p6 = scmp.lt.s32.totalorder %s27_s15, %s27_s15 }
   0xe   :  { %p1065_p5 = scmp.ne.s32.totalorder %s27_s15, %s1064_s19  ;;  %p1070_p7 = scmp.lt.s32.totalorder %s1064_s19, %s1064_s19 }
  0x10   :  { %p1071_p8 = por %p1070_p7, %p1069_p6 }
  0x12   :  { %p1072_p9 = pnand %p1071_p8, %p1065_p5 }
  0x14   :  { %1075 = shalt.err (!%p1072_p9)
}
  0x15   :  { %s1104_s20 = smov 384   ;;  %s1105_s21 = smov 24  }
  0x16   :  { %32 = dma.hbm_to_vmem [thread:$0]  %s1284_s1, 6144, %s27_s15, [#allocation6], %s1104_s20, %s1104_s20, %s1105_s21  }
  0x17   :  { %1096 = dma.done.wait [#allocation3], 32  }
  0x18   :  { %1097 = vsyncadd [#allocation3], 4294967264 }
  0x19   :  { %1098 = dma.done.wait [#allocation6], 6144  }
  0x1a   :  { %1099 = vsyncadd [#allocation6], 4294961152  ;;  %v1106_v0 = vmov 0.0   ;;  %vm1107_vm0 = vmmov 0   ;;  %v88_v1 = vld [vmem:[#allocation5 + $0x170] sm:$0xff]  ;;  %v87_v2 = vld [vmem:[#allocation5 + $0x168] sm:$0xff]  ;;  %v92_v50 = vlaneseq }
  0x1b   :  { %171 = vmatprep.mubr.f32.mxu0 %v1106_v0  ;;  %957 = vmatprep.subr.mxu1 %v1106_v0  ;;  %v85_v3 = vld [vmem:[#allocation5 + $0x158] sm:$0xff]  ;;  %v84_v4 = vld [vmem:[#allocation5 + $0x150] sm:$0xff]  ;;  %v82_v5 = vld [vmem:[#allocation5 + $0x140] sm:$0xff]  ;;  %s1108_s24 = smov 96   ;;  %s1109_s25 = smov 112   ;;  %vm464_vm1 = vcmask 130048  }
  0x1c   :  { %989 = vmatprep.mubr.msk.f32.mxu1 %vm1107_vm0, %v1106_v0  ;;  %107 = vmatprep.subr.mxu0 %v88_v1  ;;  %v81_v6 = vld [vmem:[#allocation5 + $0x138] sm:$0xff]  ;;  %v79_v7 = vld [vmem:[#allocation5 + $0x128] sm:$0xff]  ;;  %v78_v8 = vld [vmem:[#allocation5 + $0x120] sm:$0xff]  ;;  %v1169_v51 = vshrl.u32 %v92_v50, 7  ;;  %s1110_s26 = smov 64   ;;  %s1112_s27 = smov 48  }
  0x1d   :  { %108 = vmatpush1.msra.mxu0 %v87_v2  ;;  %v76_v9 = vld [vmem:[#allocation5 + $0x110] sm:$0xff]  ;;  %v75_v10 = vld [vmem:[#allocation5 + $0x108] sm:$0xff]  ;;  %v73_v11 = vld [vmem:[#allocation5 + $0xf8] sm:$0xff]  ;;  %s1113_s28 = smov 16   ;;  %s1114_s29 = smov 32   ;;  %vm617_vm2 = vcmask 64512  }
  0x1e   :  { %109 = vmatprep.subr.mxu0 %v85_v3  ;;  %v72_v12 = vld [vmem:[#allocation5 + $0xf0] sm:$0xff]  ;;  %v70_v13 = vld [vmem:[#allocation5 + $0xe0] sm:$0xff]  ;;  %v69_v14 = vld [vmem:[#allocation5 + $0xd8] sm:$0xff]  ;;  %v94_v52 = vsub.s32 0, %v1169_v51  ;;  %v98_v57 = vsub.s32 1, %v1169_v51  ;;  %v102_v63 = vsub.s32 2, %v1169_v51 }
  0x1f   :  { %110 = vmatpush1.msra.mxu0 %v84_v4  ;;  %v89_v15 = vld [vmem:[#allocation5 + $0x178] sm:$0xff]  ;;  %v86_v16 = vld [vmem:[#allocation5 + $0x160] sm:$0xff]  ;;  %v67_v17 = vld [vmem:[#allocation5 + $0xc8] sm:$0xff]  ;;  %vm897_vm3 = vcmask 261120   ;;  %vm899_vm4 = vcmask 392192   ;;  %vm901_vm5 = vcmask 523264  }
  0x20   :  { %111 = vmatprep.subr.mxu0 %v82_v5  ;;  %958 = vmatpush3.msra.mxu1 %v89_v15  ;;  %v66_v18 = vld [vmem:[#allocation5 + $0xc0] sm:$0xff]  ;;  %v83_v19 = vld [vmem:[#allocation5 + $0x148] sm:$0xff]  ;;  %v64_v20 = vld [vmem:[#allocation5 + $0xb0] sm:$0xff]  ;;  %vm903_vm6 = vcmask 654336   ;;  %vm905_vm7 = vcmask 785408   ;;  %s1117_s30 = smov [#allocation7]  }
  0x21   :  { %112 = vmatpush1.msra.mxu0 %v81_v6  ;;  %959 = vmatprep.subr.mxu1 %v1106_v0  ;;  %v63_v21 = vld [vmem:[#allocation5 + $0xa8] sm:$0xff]  ;;  %v80_v22 = vld [vmem:[#allocation5 + $0x130] sm:$0xff]  ;;  %v61_v23 = vld [vmem:[#allocation5 + $0x98] sm:$0xff]  ;;  %s916_s4 = sshll.u32 %s1117_s30, 4  ;;  %vm907_vm8 = vcmask 916480   ;;  %s917_s4 = int_to_ptr.vmem [resolvable:$true] %s916_s4 }
  0x22   :  { %113 = vmatprep.subr.mxu0 %v79_v7  ;;  %960 = vmatpush3.msra.mxu1 %v86_v16  ;;  %v60_v24 = vld [vmem:[#allocation5 + $0x90] sm:$0xff]  ;;  %v77_v25 = vld [vmem:[#allocation5 + $0x118] sm:$0xff]  ;;  %v58_v26 = vld [vmem:[#allocation5 + $0x80] sm:$0xff]  ;;  %s1076_s5 = scalar_lea.vmem %s917_s4, 32  ;;  %p1081_p11 = scmp.lt.s32.totalorder %s917_s4, %s917_s4 }
  0x23   :  { %114 = vmatpush1.msra.mxu0 %v78_v8  ;;  %961 = vmatprep.subr.mxu1 %v1106_v0  ;;  %v57_v27 = vld [vmem:[#allocation5 + $0x78] sm:$0xff]  ;;  %v74_v28 = vld [vmem:[#allocation5 + $0x100] sm:$0xff]  ;;  %v55_v29 = vld [vmem:[#allocation5 + $0x68] sm:$0xff]  ;;  %p1077_p10 = scmp.ne.s32.totalorder %s917_s4, %s1076_s5  ;;  %p1082_p12 = scmp.lt.s32.totalorder %s1076_s5, %s1076_s5 }
  0x24   :  { %115 = vmatprep.subr.mxu0 %v76_v9  ;;  %962 = vmatpush3.msra.mxu1 %v83_v19  ;;  %v54_v30 = vld [vmem:[#allocation5 + $0x60] sm:$0xff]  ;;  %v71_v31 = vld [vmem:[#allocation5 + $0xe8] sm:$0xff]  ;;  %v52_v32 = vld [vmem:[#allocation5 + $0x50] sm:$0xff]  ;;  %v1115_v9 = vmov 1983009808  }
  0x25   :  { %116 = vmatpush1.msra.mxu0 %v75_v10  ;;  %963 = vmatprep.subr.mxu1 %v1106_v0  ;;  %v51_v33 = vld [vmem:[#allocation5 + $0x48] sm:$0xff]  ;;  %v68_v34 = vld [vmem:[#allocation5 + $0xd0] sm:$0xff]  ;;  %v49_v35 = vld [vmem:[#allocation5 + $0x38] sm:$0xff]  ;;  %v272_v10 = vunpack.c.l.s4 %v1115_v9  ;;  %v1116_v19 = vmov 1934713408   ;;  %p1083_p13 = por %p1082_p12, %p1081_p11 }
  0x26   :  { %117 = vmatprep.subr.mxu0 %v73_v11  ;;  %964 = vmatpush3.msra.mxu1 %v80_v22  ;;  %v48_v36 = vld [vmem:[#allocation5 + $0x30] sm:$0xff]  ;;  %v65_v37 = vld [vmem:[#allocation5 + $0xb8] sm:$0xff]  ;;  %v46_v38 = vld [vmem:[#allocation5 + $0x20] sm:$0xff] }
  0x27   :  { %118 = vmatpush1.msra.mxu0 %v72_v12  ;;  %965 = vmatprep.subr.mxu1 %v1106_v0  ;;  %v45_v39 = vld [vmem:[#allocation5 + $0x18] sm:$0xff]  ;;  %v62_v40 = vld [vmem:[#allocation5 + $0xa0] sm:$0xff]  ;;  %v43_v41 = vld [vmem:[#allocation5 + $0x8] sm:$0xff]  ;;  %p1084_p0 = pnand %p1083_p13, %p1077_p10 }
  0x28   :  { %119 = vmatprep.subr.mxu0 %v70_v13  ;;  %966 = vmatpush3.msra.mxu1 %v77_v25  ;;  %v42_v42 = vld [vmem:[#allocation5] sm:$0xff]  ;;  %v59_v43 = vld [vmem:[#allocation5 + $0x88] sm:$0xff]  ;;  %v41_v44 = vld [vmem:[#allocation2] sm:$0x3]  ;;  %v273_v13 = vunpack.c.0.s8 %v272_v10 }
  0x29   :  { %120 = vmatpush1.msra.mxu0 %v69_v14  ;;  %967 = vmatprep.subr.mxu1 %v1106_v0  ;;  %v56_v45 = vld [vmem:[#allocation5 + $0x70] sm:$0xff]  ;;  %v53_v46 = vld [vmem:[#allocation5 + $0x58] sm:$0xff]  ;;  %v50_v47 = vld [vmem:[#allocation5 + $0x40] sm:$0xff] }
  0x2a   :  { %121 = vmatprep.subr.mxu0 %v67_v17  ;;  %968 = vmatpush3.msra.mxu1 %v74_v28  ;;  %v47_v48 = vld [vmem:[#allocation5 + $0x28] sm:$0xff]  ;;  %v44_v49 = vld [vmem:[#allocation5 + $0x10] sm:$0xff] }
  0x2b   :  { %122 = vmatpush1.msra.mxu0 %v66_v18  ;;  %969 = vmatprep.subr.mxu1 %v1106_v0  ;;  %v90_v53 = vld [vmem:[%s1285_s2] sm:$0x7]  ;;  %s1111_s2 = smov 80   ;;  %v1217_v18 = vsub.s32 %v273_v13, %v1169_v51 }
  0x2c   :  { %123 = vmatprep.subr.mxu0 %v64_v20  ;;  %970 = vmatpush3.msra.mxu1 %v71_v31  ;;  %v95_v54 = vrot.slane %v90_v53, %v94_v52  ;;  %v99_v58 = vrot.slane %v90_v53, %v98_v57  ;;  %v103_v1 = vrot.slane %v90_v53, %v102_v63  ;;  %v304_v20 = vunpack.c.l.s4 %v1116_v19 }
  0x2d   :  { %124 = vmatpush1.msra.mxu0 %v63_v21  ;;  %971 = vmatprep.subr.mxu1 %v1106_v0 }
  0x2e   :  { %125 = vmatprep.subr.mxu0 %v61_v23  ;;  %972 = vmatpush3.msra.mxu1 %v68_v34 }
  0x2f   :  { %126 = vmatpush1.msra.mxu0 %v60_v24  ;;  %973 = vmatprep.subr.mxu1 %v1106_v0 }
  0x30   :  { %127 = vmatprep.subr.mxu0 %v58_v26  ;;  %974 = vmatpush3.msra.mxu1 %v65_v37 }
  0x31   :  { %128 = vmatpush1.msra.mxu0 %v57_v27  ;;  %975 = vmatprep.subr.mxu1 %v1106_v0  ;;  %v305_v27 = vunpack.c.0.s8 %v304_v20 }
  0x32   :  { %129 = vmatprep.subr.mxu0 %v55_v29  ;;  %976 = vmatpush3.msra.mxu1 %v62_v40 }
  0x33   :  { %130 = vmatpush1.msra.mxu0 %v54_v30  ;;  %977 = vmatprep.subr.mxu1 %v1106_v0  ;;  %v1227_v37 = vsub.s32 %v305_v27, %v1169_v51 }
  0x34   :  { %131 = vmatprep.subr.mxu0 %v52_v32  ;;  %978 = vmatpush3.msra.mxu1 %v59_v43 }
  0x35   :  { %132 = vmatpush1.msra.mxu0 %v51_v33  ;;  %979 = vmatprep.subr.mxu1 %v1106_v0 }
  0x36   :  { %133 = vmatprep.subr.mxu0 %v49_v35  ;;  %980 = vmatpush3.msra.mxu1 %v56_v45 }
  0x37   :  { %134 = vmatpush1.msra.mxu0 %v48_v36  ;;  %981 = vmatprep.subr.mxu1 %v1106_v0 }
  0x38   :  { %135 = vmatprep.subr.mxu0 %v46_v38  ;;  %982 = vmatpush3.msra.mxu1 %v53_v46 }
  0x39   :  { %136 = vmatpush1.msra.mxu0 %v45_v39  ;;  %983 = vmatprep.subr.mxu1 %v1106_v0 }
  0x3a   :  { %137 = vmatprep.subr.mxu0 %v43_v41  ;;  %984 = vmatpush3.msra.mxu1 %v50_v47 }
  0x3b   :  { %138 = vmatpush1.msra.mxu0 %v42_v42  ;;  %985 = vmatprep.subr.mxu1 %v1106_v0 }
  0x3c   :  { %172 = vmatmul.mubr.f32.vlgmr.msra.gmra.mxu0 %v41_v44  ;;  %992 = vmatprep.subr.mxu0 %v1106_v0 }
  0x3d   :  { %994 = vmatprep.mubr.msk.f32.mxu0 %vm1107_vm0, %v1106_v0  ;;  %986 = vmatpush3.msra.mxu1 %v47_v48 }
  0x3e   :  { %987 = vmatprep.subr.mxu1 %v1106_v0 }
  0x3f   :  { %988 = vmatpush3.msra.mxu1 %v44_v49 }
  0x40   :  { %990 = vmatmul.mubr.f32.vlgmr.msra.gmra.mxu1 %v41_v44  ;;  %997 = vmatprep.subr.mxu1 %v1106_v0 }
  0x41   :  { %999 = vmatprep.mubr.msk.f32.mxu1 %vm1107_vm0, %v1106_v0 }
  0xfc   :  { %v173_v55 = vpop.f32.mrf.mxu0 }
  0xfd   :  { %v1175_v56 = vadd.f32 %v173_v55, %v95_v54 }
  0xfe   :  { %v175_v59 = vpop.f32.mrf.mxu0 }
  0xff   :  { %252 = vrot.lane.b32.xlu0 %v1175_v56, %s1108_s24  ;;  %249 = vrot.lane.b32.xlu1 %v1175_v56, %s1109_s25  ;;  %v176_v60 = vadd.f32 %v175_v59, %v99_v58 }
 0x100   :  { %v244_v61 = vpop.f32.mrf.mxu1 }
 0x101   :  { %v1200_v2 = vadd.f32 %v244_v61, %v103_v1 }
 0x102   :  { %v991_v62 = vpop.f32.mrf.mxu1 }
 0x103   :  { %258 = vrot.lane.b32.xlu0 %v1175_v56, %s1110_s26  ;;  %255 = vrot.lane.b32.xlu1 %v1175_v56, %s1111_s2 }
 0x107   :  { %321 = vrot.lane.b32.xlu0 %v176_v60, %s1109_s25  ;;  %261 = vrot.lane.b32.xlu1 %v1175_v56, %s1112_s27 }
 0x10b   :  { %324 = vrot.lane.b32.xlu0 %v176_v60, %s1108_s24  ;;  %327 = vrot.lane.b32.xlu1 %v176_v60, %s1111_s2 }
 0x10f   :  { %333 = vrot.lane.b32.xlu0 %v176_v60, %s1112_s27  ;;  %330 = vrot.lane.b32.xlu1 %v176_v60, %s1110_s26 }
 0x113   :  { %339 = vrot.lane.b32.xlu0 %v176_v60, %s1113_s28  ;;  %336 = vrot.lane.b32.xlu1 %v176_v60, %s1114_s29 }
 0x117   :  { %264 = vrot.lane.b32.xlu0 %v1175_v56, %s1114_s29  ;;  %267 = vrot.lane.b32.xlu1 %v1175_v56, %s1113_s28 }
 0x11b   :  { %393 = vrot.lane.b32.xlu0 %v1200_v2, %s1109_s25  ;;  %396 = vrot.lane.b32.xlu1 %v1200_v2, %s1108_s24 }
 0x11f   :  { %399 = vrot.lane.b32.xlu0 %v1200_v2, %s1111_s2  ;;  %402 = vrot.lane.b32.xlu1 %v1200_v2, %s1110_s26 }
 0x123   :  { %405 = vrot.lane.b32.xlu0 %v1200_v2, %s1112_s27  ;;  %408 = vrot.lane.b32.xlu1 %v1200_v2, %s1114_s29 }
 0x127   :  { %411 = vrot.lane.b32.xlu0 %v1200_v2, %s1113_s28 }
 0x171   :  { %v253_v3 = vpop.permute.xlu0 %252  ;;  %v250_v4 = vpop.permute.xlu1 %249 }
 0x172   :  { %v270_v24 = vcombine.low %v1175_v56, %v253_v3 }
 0x174   :  { %v277_v34 = vrot.slane %v270_v24, %v1217_v18 }
 0x175   :  { %v259_v5 = vpop.permute.xlu0 %258  ;;  %v256_v6 = vpop.permute.xlu1 %255 }
 0x176   :  { %v278_v21 = vcombine.low %v250_v4, %v256_v6 }
 0x178   :  { %v285_v30 = vrot.slane %v278_v21, %v1217_v18 }
 0x179   :  { %v322_v7 = vpop.permute.xlu0 %321  ;;  %v262_v8 = vpop.permute.xlu1 %261 }
 0x17a   :  { %v302_v41 = vcombine.low %v277_v34, %v285_v30 }
 0x17c   :  { %v309_v51 = vrot.slane %v302_v41, %v1227_v37 }
 0x17d   :  { %v325_v11 = vpop.permute.xlu0 %324  ;;  %v328_v12 = vpop.permute.xlu1 %327 }
 0x17e   :  { %v342_v14 = vcombine.low %v176_v60, %v325_v11  ;;  %v350_v15 = vcombine.low %v322_v7, %v328_v12 }
 0x180   :  { %v349_v22 = vrot.slane %v342_v14, %v1217_v18  ;;  %v357_v23 = vrot.slane %v350_v15, %v1217_v18 }
 0x181   :  { %v334_v16 = vpop.permute.xlu0 %333  ;;  %v331_v17 = vpop.permute.xlu1 %330 }
 0x182   :  { %v374_v31 = vcombine.low %v349_v22, %v357_v23 }
 0x184   :  { %v381_v42 = vrot.slane %v374_v31, %v1227_v37 }
 0x185   :  { %v340_v25 = vpop.permute.xlu0 %339  ;;  %v337_v26 = vpop.permute.xlu1 %336 }
 0x186   :  { %v366_v28 = vcombine.low %v334_v16, %v340_v25  ;;  %v358_v29 = vcombine.low %v331_v17, %v337_v26 }
 0x188   :  { %v373_v32 = vrot.slane %v366_v28, %v1217_v18  ;;  %v365_v33 = vrot.slane %v358_v29, %v1217_v18 }
 0x189   :  { %v265_v35 = vpop.permute.xlu0 %264  ;;  %v268_v36 = vpop.permute.xlu1 %267 }
 0x18a   :  { %v382_v38 = vcombine.low %v365_v33, %v373_v32  ;;  %v286_v39 = vcombine.low %v259_v5, %v265_v35  ;;  %v294_v40 = vcombine.low %v262_v8, %v268_v36 }
 0x18c   :  { %v389_v43 = vrot.slane %v382_v38, %v1227_v37  ;;  %v293_v44 = vrot.slane %v286_v39, %v1217_v18  ;;  %v301_v45 = vrot.slane %v294_v40, %v1217_v18 }
 0x18d   :  { %v394_v46 = vpop.permute.xlu0 %393  ;;  %v397_v47 = vpop.permute.xlu1 %396 }
 0x18e   :  { %v390_v48 = vcombine.low %v381_v42, %v389_v43  ;;  %v391_v49 = vcombine.high %v381_v42, %v389_v43  ;;  %v310_v50 = vcombine.low %v293_v44, %v301_v45  ;;  %v414_v58 = vcombine.low %v1200_v2, %v397_v47 }
 0x190   :  { %v317_v52 = vrot.slane %v310_v50, %v1227_v37  ;;  %993 = vmatpush3.xpose.msk.msra.mxu0 %vm464_vm1, %v390_v48  ;;  %998 = vmatpush3.xpose.msk.msra.mxu1 %vm464_vm1, %v391_v49  ;;  %v421_v62 = vrot.slane %v414_v58, %v1217_v18 }
 0x191   :  { %v400_v53 = vpop.permute.xlu0 %399  ;;  %v403_v54 = vpop.permute.xlu1 %402  ;;  %1002 = vmatprep.subr.mxu0 %v1106_v0  ;;  %1007 = vmatprep.subr.mxu1 %v1106_v0 }
 0x192   :  { %v318_v55 = vcombine.low %v309_v51, %v317_v52  ;;  %v319_v56 = vcombine.high %v309_v51, %v317_v52  ;;  %v422_v57 = vcombine.low %v394_v46, %v400_v53 }
 0x194   :  { %995 = vmatmul.mubr.msk.f32.vlgmr.msra.gmra.mxu0 %vm464_vm1, %v318_v55  ;;  %1000 = vmatmul.mubr.msk.f32.vlgmr.msra.gmra.mxu1 %vm464_vm1, %v319_v56  ;;  %v429_v61 = vrot.slane %v422_v57, %v1217_v18 }
 0x195   :  { %v406_v59 = vpop.permute.xlu0 %405  ;;  %v409_v60 = vpop.permute.xlu1 %408  ;;  %1004 = vmatprep.mubr.msk.f32.mxu0 %vm1107_vm0, %v1106_v0  ;;  %1009 = vmatprep.mubr.msk.f32.mxu1 %vm1107_vm0, %v1106_v0 }
 0x196   :  { %v430_v63 = vcombine.low %v403_v54, %v409_v60  ;;  %v446_v3 = vcombine.low %v421_v62, %v429_v61 }
 0x198   :  { %v437_v4 = vrot.slane %v430_v63, %v1217_v18  ;;  %v453_v6 = vrot.slane %v446_v3, %v1227_v37 }
 0x199   :  { %v412_v1 = vpop.permute.xlu0 %411 }
 0x19a   :  { %v438_v2 = vcombine.low %v406_v59, %v412_v1 }
 0x19c   :  { %v445_v5 = vrot.slane %v438_v2, %v1217_v18 }
 0x19e   :  { %v454_v7 = vcombine.low %v437_v4, %v445_v5 }
 0x1a0   :  { %v461_v8 = vrot.slane %v454_v7, %v1227_v37 }
 0x1a2   :  { %v462_v9 = vcombine.low %v453_v6, %v461_v8  ;;  %v463_v10 = vcombine.high %v453_v6, %v461_v8 }
 0x1a4   :  { %1003 = vmatpush3.msra.mxu0 %v462_v9  ;;  %1008 = vmatpush3.msra.mxu1 %v463_v10 }
 0x254   :  { %v537_v11 = vpop.f32.mrf.mxu0  ;;  %v613_v12 = vpop.f32.mrf.mxu1 }
 0x255   :  { %v618_v13 = vsel %vm617_vm2, %v537_v11, -inf  ;;  %v625_v14 = vsel %vm617_vm2, %v613_v12, -inf }
 0x256   :  { %v619_v15 = vrot.slane %v618_v13, 4  ;;  %v626_v16 = vrot.slane %v625_v14, 4  ;;  %v996_v17 = vpop.f32.mrf.mxu0  ;;  %v1001_v19 = vpop.f32.mrf.mxu1 }
 0x258   :  { %v620_v20 = vmax.f32 %v618_v13, %v619_v15  ;;  %v627_v21 = vmax.f32 %v625_v14, %v626_v16 }
 0x25a   :  { %v621_v22 = vrot.slane %v620_v20, 2  ;;  %v628_v23 = vrot.slane %v627_v21, 2 }
 0x25c   :  { %v622_v24 = vmax.f32 %v620_v20, %v621_v22  ;;  %v629_v25 = vmax.f32 %v627_v21, %v628_v23 }
 0x25e   :  { %v623_v26 = vrot.slane %v622_v24, 1  ;;  %v630_v27 = vrot.slane %v629_v25, 1 }
 0x260   :  { %v624_v28 = vmax.f32 %v622_v24, %v623_v26  ;;  %v631_v29 = vmax.f32 %v629_v25, %v630_v27 }
 0x262   :  { %v632_v30 = vsub.f32 %v537_v11, %v624_v28  ;;  %v633_v31 = vsub.f32 %v613_v12, %v631_v29 }
 0x264   :  { %v634_v32 = vmul.f32 1.442695, %v632_v30  ;;  %v636_v33 = vmul.f32 1.442695, %v633_v31 }
 0x266   :  { %1028 = vpow2.f32 %v634_v32 }
 0x267   :  { %1030 = vpow2.f32 %v636_v33 }
 0x273   :  { %v1029_v34 = vpop.eup %1028 }
 0x274   :  { %v1031_v35 = vpop.eup %1030  ;;  %v638_v36 = vsel %vm617_vm2, %v1029_v34, 0.0 }
 0x275   :  { %v639_v38 = vrot.slane %v638_v36, 4  ;;  %v645_v39 = vsel %vm617_vm2, %v1031_v35, 0.0 }
 0x276   :  { %v646_v40 = vrot.slane %v645_v39, 4 }
 0x277   :  { %v640_v41 = vadd.f32 %v639_v38, %v638_v36 }
 0x278   :  { %v647_v42 = vadd.f32 %v646_v40, %v645_v39 }
 0x279   :  { %v641_v43 = vrot.slane %v640_v41, 2 }
 0x27a   :  { %v648_v44 = vrot.slane %v647_v42, 2 }
 0x27b   :  { %v642_v45 = vadd.f32 %v641_v43, %v640_v41 }
 0x27c   :  { %v649_v46 = vadd.f32 %v648_v44, %v647_v42 }
 0x27d   :  { %v643_v47 = vrot.slane %v642_v45, 1 }
 0x27e   :  { %v650_v48 = vrot.slane %v649_v46, 1 }
 0x27f   :  { %v644_v49 = vadd.f32 %v643_v47, %v642_v45 }
 0x280   :  { %v651_v50 = vadd.f32 %v650_v48, %v649_v46 }
 0x281   :  { %1032 = vrcp.f32 %v644_v49 }
 0x282   :  { %1034 = vrcp.f32 %v651_v50 }
 0x28e   :  { %v1033_v51 = vpop.eup %1032 }
 0x28f   :  { %v1035_v52 = vpop.eup %1034  ;;  %v654_v53 = vmul.f32 %v1033_v51, %v1029_v34 }
 0x290   :  { %v655_v54 = vmul.f32 %v1035_v52, %v1031_v35 }
 0x291   :  { %1005 = vmatmul.mubr.msk.f32.vlgmr.msra.gmra.mxu0 %vm617_vm2, %v654_v53 }
 0x292   :  { %1010 = vmatmul.mubr.msk.f32.vlgmr.msra.gmra.mxu1 %vm617_vm2, %v655_v54 }
 0x351   :  { %v725_v55 = vpop.f32.mrf.mxu0 }
 0x352   :  { %v802_v56 = vcombine.high %v725_v55, %v1106_v0  ;;  %v809_v57 = vrot.slane %v725_v55, %v1217_v18  ;;  %v798_v58 = vpop.f32.mrf.mxu1 }
 0x353   :  { %v817_v59 = vcombine.high %v798_v58, %v1106_v0  ;;  %v824_v60 = vrot.slane %v798_v58, %v1217_v18  ;;  %v1006_v61 = vpop.f32.mrf.mxu0 }
 0x354   :  { %v816_v62 = vrot.slane %v802_v56, %v1217_v18  ;;  %v1011_v63 = vpop.f32.mrf.mxu1 }
 0x355   :  { %v831_v1 = vrot.slane %v817_v59, %v1217_v18  ;;  %v832_v3 = vcombine.low %v809_v57, %v824_v60  ;;  %v833_v2 = vcombine.high %v809_v57, %v824_v60 }
 0x357   :  { %v840_v4 = vrot.slane %v832_v3, %v1227_v37  ;;  %v848_v5 = vcombine.low %v816_v62, %v831_v1  ;;  %v847_v6 = vrot.slane %v833_v2, %v1227_v37  ;;  %v849_v8 = vcombine.high %v816_v62, %v831_v1 }
 0x359   :  { %873 = vrot.lane.b32.xlu0 %v847_v6, %s1114_s29  ;;  %v864_v7 = vcombine.high %v840_v4, %v1106_v0  ;;  %v856_v9 = vrot.slane %v848_v5, %v1227_v37  ;;  %v865_v18 = vcombine.high %v847_v6, %v1106_v0  ;;  %v863_v10 = vrot.slane %v849_v8, %v1227_v37 }
 0x35b   :  { %869 = vrot.lane.b32.xlu1 %v864_v7, %s1113_s28  ;;  %v866_v11 = vcombine.high %v856_v9, %v1106_v0  ;;  %v867_v12 = vcombine.high %v863_v10, %v1106_v0 }
 0x35d   :  { %881 = vrot.lane.b32.xlu0 %v856_v9, %s1110_s26 }
 0x35f   :  { %877 = vrot.lane.b32.xlu1 %v865_v18, %s1112_s27 }
 0x361   :  { %889 = vrot.lane.b32.xlu0 %v863_v10, %s1108_s24 }
 0x363   :  { %885 = vrot.lane.b32.xlu1 %v866_v11, %s1111_s2 }
 0x367   :  { %893 = vrot.lane.b32.xlu1 %v867_v12, %s1109_s25 }
 0x3cb   :  { %v874_v13 = vpop.permute.xlu0 %873 }
 0x3cd   :  { %v870_v14 = vpop.permute.xlu1 %869 }
 0x3ce   :  { %v896_v15 = vsel %vm464_vm1, %v840_v4, %v870_v14 }
 0x3cf   :  { %v898_v16 = vsel %vm897_vm3, %v896_v15, %v874_v13  ;;  %v882_v19 = vpop.permute.xlu0 %881 }
 0x3d1   :  { %v878_v17 = vpop.permute.xlu1 %877 }
 0x3d2   :  { %v900_v37 = vsel %vm899_vm4, %v898_v16, %v878_v17 }
 0x3d3   :  { %v902_v20 = vsel %vm901_vm5, %v900_v37, %v882_v19  ;;  %v890_v0 = vpop.permute.xlu0 %889 }
 0x3d5   :  { %v886_v21 = vpop.permute.xlu1 %885 }
 0x3d6   :  { %v904_v22 = vsel %vm903_vm6, %v902_v20, %v886_v21 }
 0x3d7   :  { %v906_v23 = vsel %vm905_vm7, %v904_v22, %v890_v0 }
 0x3d9   :  { %v894_v24 = vpop.permute.xlu1 %893 }
 0x3da   :  { %v908_v25 = vsel %vm907_vm8, %v906_v23, %v894_v24 }
 0x3db   :  { %909 = vst [vmem:[#allocation7] sm:$0x3] %v908_v25 }
 0x3dc   :  { %1087 = shalt.err (!%p1084_p0)
}
 0x3dd   :  { %919 = dma.vmem_to_hbm [thread:$0]  %s917_s4, 32, %s1286_s3, [#allocation4]  }
 0x3de   :  { %1100 = dma.done.wait [#allocation4], 32  }
 0x3df   :  { %1101 = vsyncadd [#allocation4], 4294967264 }
 0x3e0   :  { %923 = vsyncpa [#allocation3], 1 }
 0x3e1   :  { %924 = vsyncpa [#allocation6], 1 }
 0x3e2   :  { %925 = vsyncpa [#allocation4], 1 }

// kernel: tpu_custom_call.1
= control target key start
LH: loop header
LB: loop body
LE: loop exit
PB: predicated region body
PF: predicated region fallthrough
CT: control target
= control target key end

     0   :  { %8 = vsyncpa [#allocation3], 0  ;;  %s1283_s0 = inlined_call_operand.hbm [shape: f32[2,128], index: 0, kind: input, shape index: {}]   ;;  %s1284_s1 = inlined_call_operand.hbm [shape: f32[128,384], index: 1, kind: input, shape index: {}]   ;;  %s1285_s2 = inlined_call_operand.vmem [shape: f32[1,384], index: 2, kind: input, shape index: {}]   ;;  %s1286_s3 = inlined_call_operand.hbm [shape: f32[2,128], index: 3, kind: output, shape index: {}]  }
   0x1   :  { %9 = vsyncpa [#allocation6], 0 }
   0x2   :  { %10 = vsyncpa [#allocation4], 0  ;;  %s1102_s12 = smov [#allocation2]   ;;  %s1103_s14 = smov [#allocation5]  }
   0x3   :  { %s17_s13 = sshll.u32 %s1102_s12, 4  ;;  %s26_s15 = sshll.u32 %s1103_s14, 4  ;;  %s18_s13 = int_to_ptr.vmem [resolvable:$true] %s17_s13  ;;  %s27_s15 = int_to_ptr.vmem [resolvable:$true] %s26_s15 }
   0x4   :  { %s1044_s16 = scalar_lea.vmem %s18_s13, 32  ;;  %p1049_p1 = scmp.lt.s32.totalorder %s18_s13, %s18_s13 }
   0x5   :  { %p1045_p0 = scmp.ne.s32.totalorder %s18_s13, %s1044_s16  ;;  %p1050_p2 = scmp.lt.s32.totalorder %s1044_s16, %s1044_s16 }
   0x7   :  { %p1051_p3 = por %p1050_p2, %p1049_p1 }
   0x9   :  { %p1052_p4 = pnand %p1051_p3, %p1045_p0 }
   0xb   :  { %1055 = shalt.err (!%p1052_p4)
}
   0xc   :  { %20 = dma.hbm_to_vmem [thread:$0]  %s1283_s0, 32, %s18_s13, [#allocation3]  }
   0xd   :  { %s1064_s19 = scalar_lea.vmem %s27_s15, 6144  ;;  %p1069_p6 = scmp.lt.s32.totalorder %s27_s15, %s27_s15 }
   0xe   :  { %p1065_p5 = scmp.ne.s32.totalorder %s27_s15, %s1064_s19  ;;  %p1070_p7 = scmp.lt.s32.totalorder %s1064_s19, %s1064_s19 }
  0x10   :  { %p1071_p8 = por %p1070_p7, %p1069_p6 }
  0x12   :  { %p1072_p9 = pnand %p1071_p8, %p1065_p5 }
  0x14   :  { %1075 = shalt.err (!%p1072_p9)
}
  0x15   :  { %s1104_s20 = smov 384   ;;  %s1105_s21 = smov 24  }
  0x16   :  { %32 = dma.hbm_to_vmem [thread:$0]  %s1284_s1, 6144, %s27_s15, [#allocation6], %s1104_s20, %s1104_s20, %s1105_s21  }
  0x17   :  { %1096 = dma.done.wait [#allocation3], 32  }
  0x18   :  { %1097 = vsyncadd [#allocation3], 4294967264 }
  0x19   :  { %1098 = dma.done.wait [#allocation6], 6144  }
  0x1a   :  { %1099 = vsyncadd [#allocation6], 4294961152  ;;  %v1106_v0 = vmov 0.0   ;;  %vm1107_vm0 = vmmov 0   ;;  %v88_v1 = vld [vmem:[#allocation5 + $0x170] sm:$0xff]  ;;  %v87_v2 = vld [vmem:[#allocation5 + $0x168] sm:$0xff]  ;;  %v92_v50 = vlaneseq }
  0x1b   :  { %171 = vmatprep.mubr.f32.mxu0 %v1106_v0  ;;  %957 = vmatprep.subr.mxu1 %v1106_v0  ;;  %v85_v3 = vld [vmem:[#allocation5 + $0x158] sm:$0xff]  ;;  %v84_v4 = vld [vmem:[#allocation5 + $0x150] sm:$0xff]  ;;  %v82_v5 = vld [vmem:[#allocation5 + $0x140] sm:$0xff]  ;;  %s1108_s24 = smov 96   ;;  %s1109_s25 = smov 112   ;;  %vm464_vm1 = vcmask 130048  }
  0x1c   :  { %989 = vmatprep.mubr.msk.f32.mxu1 %vm1107_vm0, %v1106_v0  ;;  %107 = vmatprep.subr.mxu0 %v88_v1  ;;  %v81_v6 = vld [vmem:[#allocation5 + $0x138] sm:$0xff]  ;;  %v79_v7 = vld [vmem:[#allocation5 + $0x128] sm:$0xff]  ;;  %v78_v8 = vld [vmem:[#allocation5 + $0x120] sm:$0xff]  ;;  %v1169_v51 = vshrl.u32 %v92_v50, 7  ;;  %s1110_s26 = smov 64   ;;  %s1112_s27 = smov 48  }
  0x1d   :  { %108 = vmatpush1.msra.mxu0 %v87_v2  ;;  %v76_v9 = vld [vmem:[#allocation5 + $0x110] sm:$0xff]  ;;  %v75_v10 = vld [vmem:[#allocation5 + $0x108] sm:$0xff]  ;;  %v73_v11 = vld [vmem:[#allocation5 + $0xf8] sm:$0xff]  ;;  %s1113_s28 = smov 16   ;;  %s1114_s29 = smov 32   ;;  %vm617_vm2 = vcmask 64512  }
  0x1e   :  { %109 = vmatprep.subr.mxu0 %v85_v3  ;;  %v72_v12 = vld [vmem:[#allocation5 + $0xf0] sm:$0xff]  ;;  %v70_v13 = vld [vmem:[#allocation5 + $0xe0] sm:$0xff]  ;;  %v69_v14 = vld [vmem:[#allocation5 + $0xd8] sm:$0xff]  ;;  %v94_v52 = vsub.s32 0, %v1169_v51  ;;  %v98_v57 = vsub.s32 1, %v1169_v51  ;;  %v102_v63 = vsub.s32 2, %v1169_v51 }
  0x1f   :  { %110 = vmatpush1.msra.mxu0 %v84_v4  ;;  %v89_v15 = vld [vmem:[#allocation5 + $0x178] sm:$0xff]  ;;  %v86_v16 = vld [vmem:[#allocation5 + $0x160] sm:$0xff]  ;;  %v67_v17 = vld [vmem:[#allocation5 + $0xc8] sm:$0xff]  ;;  %vm897_vm3 = vcmask 261120   ;;  %vm899_vm4 = vcmask 392192   ;;  %vm901_vm5 = vcmask 523264  }
  0x20   :  { %111 = vmatprep.subr.mxu0 %v82_v5  ;;  %958 = vmatpush3.msra.mxu1 %v89_v15  ;;  %v66_v18 = vld [vmem:[#allocation5 + $0xc0] sm:$0xff]  ;;  %v83_v19 = vld [vmem:[#allocation5 + $0x148] sm:$0xff]  ;;  %v64_v20 = vld [vmem:[#allocation5 + $0xb0] sm:$0xff]  ;;  %vm903_vm6 = vcmask 654336   ;;  %vm905_vm7 = vcmask 785408   ;;  %s1117_s30 = smov [#allocation7]  }
  0x21   :  { %112 = vmatpush1.msra.mxu0 %v81_v6  ;;  %959 = vmatprep.subr.mxu1 %v1106_v0  ;;  %v63_v21 = vld [vmem:[#allocation5 + $0xa8] sm:$0xff]  ;;  %v80_v22 = vld [vmem:[#allocation5 + $0x130] sm:$0xff]  ;;  %v61_v23 = vld [vmem:[#allocation5 + $0x98] sm:$0xff]  ;;  %s916_s4 = sshll.u32 %s1117_s30, 4  ;;  %vm907_vm8 = vcmask 916480   ;;  %s917_s4 = int_to_ptr.vmem [resolvable:$true] %s916_s4 }
  0x22   :  { %113 = vmatprep.subr.mxu0 %v79_v7  ;;  %960 = vmatpush3.msra.mxu1 %v86_v16  ;;  %v60_v24 = vld [vmem:[#allocation5 + $0x90] sm:$0xff]  ;;  %v77_v25 = vld [vmem:[#allocation5 + $0x118] sm:$0xff]  ;;  %v58_v26 = vld [vmem:[#allocation5 + $0x80] sm:$0xff]  ;;  %s1076_s5 = scalar_lea.vmem %s917_s4, 32  ;;  %p1081_p11 = scmp.lt.s32.totalorder %s917_s4, %s917_s4 }
  0x23   :  { %114 = vmatpush1.msra.mxu0 %v78_v8  ;;  %961 = vmatprep.subr.mxu1 %v1106_v0  ;;  %v57_v27 = vld [vmem:[#allocation5 + $0x78] sm:$0xff]  ;;  %v74_v28 = vld [vmem:[#allocation5 + $0x100] sm:$0xff]  ;;  %v55_v29 = vld [vmem:[#allocation5 + $0x68] sm:$0xff]  ;;  %p1077_p10 = scmp.ne.s32.totalorder %s917_s4, %s1076_s5  ;;  %p1082_p12 = scmp.lt.s32.totalorder %s1076_s5, %s1076_s5 }
  0x24   :  { %115 = vmatprep.subr.mxu0 %v76_v9  ;;  %962 = vmatpush3.msra.mxu1 %v83_v19  ;;  %v54_v30 = vld [vmem:[#allocation5 + $0x60] sm:$0xff]  ;;  %v71_v31 = vld [vmem:[#allocation5 + $0xe8] sm:$0xff]  ;;  %v52_v32 = vld [vmem:[#allocation5 + $0x50] sm:$0xff]  ;;  %v1115_v9 = vmov 1983009808  }
  0x25   :  { %116 = vmatpush1.msra.mxu0 %v75_v10  ;;  %963 = vmatprep.subr.mxu1 %v1106_v0  ;;  %v51_v33 = vld [vmem:[#allocation5 + $0x48] sm:$0xff]  ;;  %v68_v34 = vld [vmem:[#allocation5 + $0xd0] sm:$0xff]  ;;  %v49_v35 = vld [vmem:[#allocation5 + $0x38] sm:$0xff]  ;;  %v272_v10 = vunpack.c.l.s4 %v1115_v9  ;;  %v1116_v19 = vmov 1934713408   ;;  %p1083_p13 = por %p1082_p12, %p1081_p11 }
  0x26   :  { %117 = vmatprep.subr.mxu0 %v73_v11  ;;  %964 = vmatpush3.msra.mxu1 %v80_v22  ;;  %v48_v36 = vld [vmem:[#allocation5 + $0x30] sm:$0xff]  ;;  %v65_v37 = vld [vmem:[#allocation5 + $0xb8] sm:$0xff]  ;;  %v46_v38 = vld [vmem:[#allocation5 + $0x20] sm:$0xff] }
  0x27   :  { %118 = vmatpush1.msra.mxu0 %v72_v12  ;;  %965 = vmatprep.subr.mxu1 %v1106_v0  ;;  %v45_v39 = vld [vmem:[#allocation5 + $0x18] sm:$0xff]  ;;  %v62_v40 = vld [vmem:[#allocation5 + $0xa0] sm:$0xff]  ;;  %v43_v41 = vld [vmem:[#allocation5 + $0x8] sm:$0xff]  ;;  %p1084_p0 = pnand %p1083_p13, %p1077_p10 }
  0x28   :  { %119 = vmatprep.subr.mxu0 %v70_v13  ;;  %966 = vmatpush3.msra.mxu1 %v77_v25  ;;  %v42_v42 = vld [vmem:[#allocation5] sm:$0xff]  ;;  %v59_v43 = vld [vmem:[#allocation5 + $0x88] sm:$0xff]  ;;  %v41_v44 = vld [vmem:[#allocation2] sm:$0x3]  ;;  %v273_v13 = vunpack.c.0.s8 %v272_v10 }
  0x29   :  { %120 = vmatpush1.msra.mxu0 %v69_v14  ;;  %967 = vmatprep.subr.mxu1 %v1106_v0  ;;  %v56_v45 = vld [vmem:[#allocation5 + $0x70] sm:$0xff]  ;;  %v53_v46 = vld [vmem:[#allocation5 + $0x58] sm:$0xff]  ;;  %v50_v47 = vld [vmem:[#allocation5 + $0x40] sm:$0xff] }
  0x2a   :  { %121 = vmatprep.subr.mxu0 %v67_v17  ;;  %968 = vmatpush3.msra.mxu1 %v74_v28  ;;  %v47_v48 = vld [vmem:[#allocation5 + $0x28] sm:$0xff]  ;;  %v44_v49 = vld [vmem:[#allocation5 + $0x10] sm:$0xff] }
  0x2b   :  { %122 = vmatpush1.msra.mxu0 %v66_v18  ;;  %969 = vmatprep.subr.mxu1 %v1106_v0  ;;  %v90_v53 = vld [vmem:[%s1285_s2] sm:$0x7]  ;;  %s1111_s2 = smov 80   ;;  %v1217_v18 = vsub.s32 %v273_v13, %v1169_v51 }
  0x2c   :  { %123 = vmatprep.subr.mxu0 %v64_v20  ;;  %970 = vmatpush3.msra.mxu1 %v71_v31  ;;  %v95_v54 = vrot.slane %v90_v53, %v94_v52  ;;  %v99_v58 = vrot.slane %v90_v53, %v98_v57  ;;  %v103_v1 = vrot.slane %v90_v53, %v102_v63  ;;  %v304_v20 = vunpack.c.l.s4 %v1116_v19 }
  0x2d   :  { %124 = vmatpush1.msra.mxu0 %v63_v21  ;;  %971 = vmatprep.subr.mxu1 %v1106_v0 }
  0x2e   :  { %125 = vmatprep.subr.mxu0 %v61_v23  ;;  %972 = vmatpush3.msra.mxu1 %v68_v34 }
  0x2f   :  { %126 = vmatpush1.msra.mxu0 %v60_v24  ;;  %973 = vmatprep.subr.mxu1 %v1106_v0 }
  0x30   :  { %127 = vmatprep.subr.mxu0 %v58_v26  ;;  %974 = vmatpush3.msra.mxu1 %v65_v37 }
  0x31   :  { %128 = vmatpush1.msra.mxu0 %v57_v27  ;;  %975 = vmatprep.subr.mxu1 %v1106_v0  ;;  %v305_v27 = vunpack.c.0.s8 %v304_v20 }
  0x32   :  { %129 = vmatprep.subr.mxu0 %v55_v29  ;;  %976 = vmatpush3.msra.mxu1 %v62_v40 }
  0x33   :  { %130 = vmatpush1.msra.mxu0 %v54_v30  ;;  %977 = vmatprep.subr.mxu1 %v1106_v0  ;;  %v1227_v37 = vsub.s32 %v305_v27, %v1169_v51 }
  0x34   :  { %131 = vmatprep.subr.mxu0 %v52_v32  ;;  %978 = vmatpush3.msra.mxu1 %v59_v43 }
  0x35   :  { %132 = vmatpush1.msra.mxu0 %v51_v33  ;;  %979 = vmatprep.subr.mxu1 %v1106_v0 }
  0x36   :  { %133 = vmatprep.subr.mxu0 %v49_v35  ;;  %980 = vmatpush3.msra.mxu1 %v56_v45 }
  0x37   :  { %134 = vmatpush1.msra.mxu0 %v48_v36  ;;  %981 = vmatprep.subr.mxu1 %v1106_v0 }
  0x38   :  { %135 = vmatprep.subr.mxu0 %v46_v38  ;;  %982 = vmatpush3.msra.mxu1 %v53_v46 }
  0x39   :  { %136 = vmatpush1.msra.mxu0 %v45_v39  ;;  %983 = vmatprep.subr.mxu1 %v1106_v0 }
  0x3a   :  { %137 = vmatprep.subr.mxu0 %v43_v41  ;;  %984 = vmatpush3.msra.mxu1 %v50_v47 }
  0x3b   :  { %138 = vmatpush1.msra.mxu0 %v42_v42  ;;  %985 = vmatprep.subr.mxu1 %v1106_v0 }
  0x3c   :  { %172 = vmatmul.mubr.f32.vlgmr.msra.gmra.mxu0 %v41_v44  ;;  %992 = vmatprep.subr.mxu0 %v1106_v0 }
  0x3d   :  { %994 = vmatprep.mubr.msk.f32.mxu0 %vm1107_vm0, %v1106_v0  ;;  %986 = vmatpush3.msra.mxu1 %v47_v48 }
  0x3e   :  { %987 = vmatprep.subr.mxu1 %v1106_v0 }
  0x3f   :  { %988 = vmatpush3.msra.mxu1 %v44_v49 }
  0x40   :  { %990 = vmatmul.mubr.f32.vlgmr.msra.gmra.mxu1 %v41_v44  ;;  %997 = vmatprep.subr.mxu1 %v1106_v0 }
  0x41   :  { %999 = vmatprep.mubr.msk.f32.mxu1 %vm1107_vm0, %v1106_v0 }
  0xfc   :  { %v173_v55 = vpop.f32.mrf.mxu0 }
  0xfd   :  { %v1175_v56 = vadd.f32 %v173_v55, %v95_v54 }
  0xfe   :  { %v175_v59 = vpop.f32.mrf.mxu0 }
  0xff   :  { %252 = vrot.lane.b32.xlu0 %v1175_v56, %s1108_s24  ;;  %249 = vrot.lane.b32.xlu1 %v1175_v56, %s1109_s25  ;;  %v176_v60 = vadd.f32 %v175_v59, %v99_v58 }
 0x100   :  { %v244_v61 = vpop.f32.mrf.mxu1 }
 0x101   :  { %v1200_v2 = vadd.f32 %v244_v61, %v103_v1 }
 0x102   :  { %v991_v62 = vpop.f32.mrf.mxu1 }
 0x103   :  { %258 = vrot.lane.b32.xlu0 %v1175_v56, %s1110_s26  ;;  %255 = vrot.lane.b32.xlu1 %v1175_v56, %s1111_s2 }
 0x107   :  { %321 = vrot.lane.b32.xlu0 %v176_v60, %s1109_s25  ;;  %261 = vrot.lane.b32.xlu1 %v1175_v56, %s1112_s27 }
 0x10b   :  { %324 = vrot.lane.b32.xlu0 %v176_v60, %s1108_s24  ;;  %327 = vrot.lane.b32.xlu1 %v176_v60, %s1111_s2 }
 0x10f   :  { %333 = vrot.lane.b32.xlu0 %v176_v60, %s1112_s27  ;;  %330 = vrot.lane.b32.xlu1 %v176_v60, %s1110_s26 }
 0x113   :  { %339 = vrot.lane.b32.xlu0 %v176_v60, %s1113_s28  ;;  %336 = vrot.lane.b32.xlu1 %v176_v60, %s1114_s29 }
 0x117   :  { %264 = vrot.lane.b32.xlu0 %v1175_v56, %s1114_s29  ;;  %267 = vrot.lane.b32.xlu1 %v1175_v56, %s1113_s28 }
 0x11b   :  { %393 = vrot.lane.b32.xlu0 %v1200_v2, %s1109_s25  ;;  %396 = vrot.lane.b32.xlu1 %v1200_v2, %s1108_s24 }
 0x11f   :  { %399 = vrot.lane.b32.xlu0 %v1200_v2, %s1111_s2  ;;  %402 = vrot.lane.b32.xlu1 %v1200_v2, %s1110_s26 }
 0x123   :  { %405 = vrot.lane.b32.xlu0 %v1200_v2, %s1112_s27  ;;  %408 = vrot.lane.b32.xlu1 %v1200_v2, %s1114_s29 }
 0x127   :  { %411 = vrot.lane.b32.xlu0 %v1200_v2, %s1113_s28 }
 0x171   :  { %v253_v3 = vpop.permute.xlu0 %252  ;;  %v250_v4 = vpop.permute.xlu1 %249 }
 0x172   :  { %v270_v24 = vcombine.low %v1175_v56, %v253_v3 }
 0x174   :  { %v277_v34 = vrot.slane %v270_v24, %v1217_v18 }
 0x175   :  { %v259_v5 = vpop.permute.xlu0 %258  ;;  %v256_v6 = vpop.permute.xlu1 %255 }
 0x176   :  { %v278_v21 = vcombine.low %v250_v4, %v256_v6 }
 0x178   :  { %v285_v30 = vrot.slane %v278_v21, %v1217_v18 }
 0x179   :  { %v322_v7 = vpop.permute.xlu0 %321  ;;  %v262_v8 = vpop.permute.xlu1 %261 }
 0x17a   :  { %v302_v41 = vcombine.low %v277_v34, %v285_v30 }
 0x17c   :  { %v309_v51 = vrot.slane %v302_v41, %v1227_v37 }
 0x17d   :  { %v325_v11 = vpop.permute.xlu0 %324  ;;  %v328_v12 = vpop.permute.xlu1 %327 }
 0x17e   :  { %v342_v14 = vcombine.low %v176_v60, %v325_v11  ;;  %v350_v15 = vcombine.low %v322_v7, %v328_v12 }
 0x180   :  { %v349_v22 = vrot.slane %v342_v14, %v1217_v18  ;;  %v357_v23 = vrot.slane %v350_v15, %v1217_v18 }
 0x181   :  { %v334_v16 = vpop.permute.xlu0 %333  ;;  %v331_v17 = vpop.permute.xlu1 %330 }
 0x182   :  { %v374_v31 = vcombine.low %v349_v22, %v357_v23 }
 0x184   :  { %v381_v42 = vrot.slane %v374_v31, %v1227_v37 }
 0x185   :  { %v340_v25 = vpop.permute.xlu0 %339  ;;  %v337_v26 = vpop.permute.xlu1 %336 }
 0x186   :  { %v366_v28 = vcombine.low %v334_v16, %v340_v25  ;;  %v358_v29 = vcombine.low %v331_v17, %v337_v26 }
 0x188   :  { %v373_v32 = vrot.slane %v366_v28, %v1217_v18  ;;  %v365_v33 = vrot.slane %v358_v29, %v1217_v18 }
 0x189   :  { %v265_v35 = vpop.permute.xlu0 %264  ;;  %v268_v36 = vpop.permute.xlu1 %267 }
 0x18a   :  { %v382_v38 = vcombine.low %v365_v33, %v373_v32  ;;  %v286_v39 = vcombine.low %v259_v5, %v265_v35  ;;  %v294_v40 = vcombine.low %v262_v8, %v268_v36 }
 0x18c   :  { %v389_v43 = vrot.slane %v382_v38, %v1227_v37  ;;  %v293_v44 = vrot.slane %v286_v39, %v1217_v18  ;;  %v301_v45 = vrot.slane %v294_v40, %v1217_v18 }
 0x18d   :  { %v394_v46 = vpop.permute.xlu0 %393  ;;  %v397_v47 = vpop.permute.xlu1 %396 }
 0x18e   :  { %v390_v48 = vcombine.low %v381_v42, %v389_v43  ;;  %v391_v49 = vcombine.high %v381_v42, %v389_v43  ;;  %v310_v50 = vcombine.low %v293_v44, %v301_v45  ;;  %v414_v58 = vcombine.low %v1200_v2, %v397_v47 }
 0x190   :  { %v317_v52 = vrot.slane %v310_v50, %v1227_v37  ;;  %993 = vmatpush3.xpose.msk.msra.mxu0 %vm464_vm1, %v390_v48  ;;  %998 = vmatpush3.xpose.msk.msra.mxu1 %vm464_vm1, %v391_v49  ;;  %v421_v62 = vrot.slane %v414_v58, %v1217_v18 }
 0x191   :  { %v400_v53 = vpop.permute.xlu0 %399  ;;  %v403_v54 = vpop.permute.xlu1 %402  ;;  %1002 = vmatprep.subr.mxu0 %v1106_v0  ;;  %1007 = vmatprep.subr.mxu1 %v1106_v0 }
 0x192   :  { %v318_v55 = vcombine.low %v309_v51, %v317_v52  ;;  %v319_v56 = vcombine.high %v309_v51, %v317_v52  ;;  %v422_v57 = vcombine.low %v394_v46, %v400_v53 }
 0x194   :  { %995 = vmatmul.mubr.msk.f32.vlgmr.msra.gmra.mxu0 %vm464_vm1, %v318_v55  ;;  %1000 = vmatmul.mubr.msk.f32.vlgmr.msra.gmra.mxu1 %vm464_vm1, %v319_v56  ;;  %v429_v61 = vrot.slane %v422_v57, %v1217_v18 }
 0x195   :  { %v406_v59 = vpop.permute.xlu0 %405  ;;  %v409_v60 = vpop.permute.xlu1 %408  ;;  %1004 = vmatprep.mubr.msk.f32.mxu0 %vm1107_vm0, %v1106_v0  ;;  %1009 = vmatprep.mubr.msk.f32.mxu1 %vm1107_vm0, %v1106_v0 }
 0x196   :  { %v430_v63 = vcombine.low %v403_v54, %v409_v60  ;;  %v446_v3 = vcombine.low %v421_v62, %v429_v61 }
 0x198   :  { %v437_v4 = vrot.slane %v430_v63, %v1217_v18  ;;  %v453_v6 = vrot.slane %v446_v3, %v1227_v37 }
 0x199   :  { %v412_v1 = vpop.permute.xlu0 %411 }
 0x19a   :  { %v438_v2 = vcombine.low %v406_v59, %v412_v1 }
 0x19c   :  { %v445_v5 = vrot.slane %v438_v2, %v1217_v18 }
 0x19e   :  { %v454_v7 = vcombine.low %v437_v4, %v445_v5 }
 0x1a0   :  { %v461_v8 = vrot.slane %v454_v7, %v1227_v37 }
 0x1a2   :  { %v462_v9 = vcombine.low %v453_v6, %v461_v8  ;;  %v463_v10 = vcombine.high %v453_v6, %v461_v8 }
 0x1a4   :  { %1003 = vmatpush3.msra.mxu0 %v462_v9  ;;  %1008 = vmatpush3.msra.mxu1 %v463_v10 }
 0x254   :  { %v537_v11 = vpop.f32.mrf.mxu0  ;;  %v613_v12 = vpop.f32.mrf.mxu1 }
 0x255   :  { %v618_v13 = vsel %vm617_vm2, %v537_v11, -inf  ;;  %v625_v14 = vsel %vm617_vm2, %v613_v12, -inf }
 0x256   :  { %v619_v15 = vrot.slane %v618_v13, 4  ;;  %v626_v16 = vrot.slane %v625_v14, 4  ;;  %v996_v17 = vpop.f32.mrf.mxu0  ;;  %v1001_v19 = vpop.f32.mrf.mxu1 }
 0x258   :  { %v620_v20 = vmax.f32 %v618_v13, %v619_v15  ;;  %v627_v21 = vmax.f32 %v625_v14, %v626_v16 }
 0x25a   :  { %v621_v22 = vrot.slane %v620_v20, 2  ;;  %v628_v23 = vrot.slane %v627_v21, 2 }
 0x25c   :  { %v622_v24 = vmax.f32 %v620_v20, %v621_v22  ;;  %v629_v25 = vmax.f32 %v627_v21, %v628_v23 }
 0x25e   :  { %v623_v26 = vrot.slane %v622_v24, 1  ;;  %v630_v27 = vrot.slane %v629_v25, 1 }
 0x260   :  { %v624_v28 = vmax.f32 %v622_v24, %v623_v26  ;;  %v631_v29 = vmax.f32 %v629_v25, %v630_v27 }
 0x262   :  { %v632_v30 = vsub.f32 %v537_v11, %v624_v28  ;;  %v633_v31 = vsub.f32 %v613_v12, %v631_v29 }
 0x264   :  { %v634_v32 = vmul.f32 1.442695, %v632_v30  ;;  %v636_v33 = vmul.f32 1.442695, %v633_v31 }
 0x266   :  { %1028 = vpow2.f32 %v634_v32 }
 0x267   :  { %1030 = vpow2.f32 %v636_v33 }
 0x273   :  { %v1029_v34 = vpop.eup %1028 }
 0x274   :  { %v1031_v35 = vpop.eup %1030  ;;  %v638_v36 = vsel %vm617_vm2, %v1029_v34, 0.0 }
 0x275   :  { %v639_v38 = vrot.slane %v638_v36, 4  ;;  %v645_v39 = vsel %vm617_vm2, %v1031_v35, 0.0 }
 0x276   :  { %v646_v40 = vrot.slane %v645_v39, 4 }
 0x277   :  { %v640_v41 = vadd.f32 %v639_v38, %v638_v36 }
 0x278   :  { %v647_v42 = vadd.f32 %v646_v40, %v645_v39 }
 0x279   :  { %v641_v43 = vrot.slane %v640_v41, 2 }
 0x27a   :  { %v648_v44 = vrot.slane %v647_v42, 2 }
 0x27b   :  { %v642_v45 = vadd.f32 %v641_v43, %v640_v41 }
 0x27c   :  { %v649_v46 = vadd.f32 %v648_v44, %v647_v42 }
 0x27d   :  { %v643_v47 = vrot.slane %v642_v45, 1 }
 0x27e   :  { %v650_v48 = vrot.slane %v649_v46, 1 }
 0x27f   :  { %v644_v49 = vadd.f32 %v643_v47, %v642_v45 }
 0x280   :  { %v651_v50 = vadd.f32 %v650_v48, %v649_v46 }
 0x281   :  { %1032 = vrcp.f32 %v644_v49 }
 0x282   :  { %1034 = vrcp.f32 %v651_v50 }
 0x28e   :  { %v1033_v51 = vpop.eup %1032 }
 0x28f   :  { %v1035_v52 = vpop.eup %1034  ;;  %v654_v53 = vmul.f32 %v1033_v51, %v1029_v34 }
 0x290   :  { %v655_v54 = vmul.f32 %v1035_v52, %v1031_v35 }
 0x291   :  { %1005 = vmatmul.mubr.msk.f32.vlgmr.msra.gmra.mxu0 %vm617_vm2, %v654_v53 }
 0x292   :  { %1010 = vmatmul.mubr.msk.f32.vlgmr.msra.gmra.mxu1 %vm617_vm2, %v655_v54 }
 0x351   :  { %v725_v55 = vpop.f32.mrf.mxu0 }
 0x352   :  { %v802_v56 = vcombine.high %v725_v55, %v1106_v0  ;;  %v809_v57 = vrot.slane %v725_v55, %v1217_v18  ;;  %v798_v58 = vpop.f32.mrf.mxu1 }
 0x353   :  { %v817_v59 = vcombine.high %v798_v58, %v1106_v0  ;;  %v824_v60 = vrot.slane %v798_v58, %v1217_v18  ;;  %v1006_v61 = vpop.f32.mrf.mxu0 }
 0x354   :  { %v816_v62 = vrot.slane %v802_v56, %v1217_v18  ;;  %v1011_v63 = vpop.f32.mrf.mxu1 }
 0x355   :  { %v831_v1 = vrot.slane %v817_v59, %v1217_v18  ;;  %v832_v3 = vcombine.low %v809_v57, %v824_v60  ;;  %v833_v2 = vcombine.high %v809_v57, %v824_v60 }
 0x357   :  { %v840_v4 = vrot.slane %v832_v3, %v1227_v37  ;;  %v848_v5 = vcombine.low %v816_v62, %v831_v1  ;;  %v847_v6 = vrot.slane %v833_v2, %v1227_v37  ;;  %v849_v8 = vcombine.high %v816_v62, %v831_v1 }
 0x359   :  { %873 = vrot.lane.b32.xlu0 %v847_v6, %s1114_s29  ;;  %v864_v7 = vcombine.high %v840_v4, %v1106_v0  ;;  %v856_v9 = vrot.slane %v848_v5, %v1227_v37  ;;  %v865_v18 = vcombine.high %v847_v6, %v1106_v0  ;;  %v863_v10 = vrot.slane %v849_v8, %v1227_v37 }
 0x35b   :  { %869 = vrot.lane.b32.xlu1 %v864_v7, %s1113_s28  ;;  %v866_v11 = vcombine.high %v856_v9, %v1106_v0  ;;  %v867_v12 = vcombine.high %v863_v10, %v1106_v0 }
 0x35d   :  { %881 = vrot.lane.b32.xlu0 %v856_v9, %s1110_s26 }
 0x35f   :  { %877 = vrot.lane.b32.xlu1 %v865_v18, %s1112_s27 }
 0x361   :  { %889 = vrot.lane.b32.xlu0 %v863_v10, %s1108_s24 }
 0x363   :  { %885 = vrot.lane.b32.xlu1 %v866_v11, %s1111_s2 }
 0x367   :  { %893 = vrot.lane.b32.xlu1 %v867_v12, %s1109_s25 }
 0x3cb   :  { %v874_v13 = vpop.permute.xlu0 %873 }
 0x3cd   :  { %v870_v14 = vpop.permute.xlu1 %869 }
 0x3ce   :  { %v896_v15 = vsel %vm464_vm1, %v840_v4, %v870_v14 }
 0x3cf   :  { %v898_v16 = vsel %vm897_vm3, %v896_v15, %v874_v13  ;;  %v882_v19 = vpop.permute.xlu0 %881 }
 0x3d1   :  { %v878_v17 = vpop.permute.xlu1 %877 }
 0x3d2   :  { %v900_v37 = vsel %vm899_vm4, %v898_v16, %v878_v17 }
 0x3d3   :  { %v902_v20 = vsel %vm901_vm5, %v900_v37, %v882_v19  ;;  %v890_v0 = vpop.permute.xlu0 %889 }
 0x3d5   :  { %v886_v21 = vpop.permute.xlu1 %885 }
 0x3d6   :  { %v904_v22 = vsel %vm903_vm6, %v902_v20, %v886_v21 }
 0x3d7   :  { %v906_v23 = vsel %vm905_vm7, %v904_v22, %v890_v0 }
 0x3d9   :  { %v894_v24 = vpop.permute.xlu1 %893 }
 0x3da   :  { %v908_v25 = vsel %vm907_vm8, %v906_v23, %v894_v24 }
 0x3db   :  { %909 = vst [vmem:[#allocation7] sm:$0x3] %v908_v25 }
 0x3dc   :  { %1087 = shalt.err (!%p1084_p0)
}
 0x3dd   :  { %919 = dma.vmem_to_hbm [thread:$0]  %s917_s4, 32, %s1286_s3, [#allocation4]  }
 0x3de   :  { %1100 = dma.done.wait [#allocation4], 32  }
 0x3df   :  { %1101 = vsyncadd [#allocation4], 4294967264 }
 0x3e0   :  { %923 = vsyncpa [#allocation3], 1 }
 0x3e1   :  { %924 = vsyncpa [#allocation6], 1 }
 0x3e2   :  { %925 = vsyncpa [#allocation4], 1 }

</bundles_post_ra>
